<compile_context>
chip_gen: v7x
topology: tpu7x:2x2x1
jax: 0.10.0
libtpu: 0.0.40
codegen_flags: <defaults>
</compile_context>

<pallas_src>
import functools

import jax
import jax.numpy as jnp
from jax.experimental import pallas as pl
from jax.experimental.pallas import tpu as pltpu


def _cnn_kernel(x_ref, w_ref, b_ref, o_ref, *, L, L_out):
    # x_ref: (TB*L, C)  char embeddings, rows ordered (example, position)  [NLC]
    # w_ref: (K*C, O)   conv weight, rows ordered (tap k, channel c)       [resident]
    # b_ref: (1, O)     conv bias                                          [resident]
    # o_ref: (TB, O)    pooled output for this batch block
    N, C = x_ref.shape            # N = TB * L
    KC, O = w_ref.shape
    K = KC // C
    TB = N // L

    x = x_ref[...]                                              # (N, C)

    # Pad K-1 zero rows so every shifted slice below has exactly N rows.
    if K > 1:
        xp = jnp.concatenate(
            [x, jnp.zeros((K - 1, C), dtype=x.dtype)], axis=0)  # (N+K-1, C)
    else:
        xp = x

    # im2col: patches[r, k*C + c] = x[r + k, c]
    patches = jnp.concatenate(
        [xp[k:k + N, :] for k in range(K)], axis=1)             # (N, K*C)

    # Whole conv as one MXU matmul (contraction dim K*C), f32 accumulation.
    y = jnp.dot(patches, w_ref[...], preferred_element_type=jnp.float32)
    y = jnp.maximum(y + b_ref[...], 0.0)                        # bias + ReLU, (N, O)

    # (TB, L, O): O stays in lanes, conv-position axis goes to sublanes only
    # through a major-dim split (no lane movement).
    y = y.reshape(TB, L, O)

    # Positions t >= L_out are invalid (window ran past the word / into the
    # next example).  Mask with 0 post-ReLU (exact for the max, see header).
    if L_out < L:
        t_idx = jax.lax.broadcasted_iota(jnp.int32, (1, L, 1), 1)
        y = jnp.where(t_idx < L_out, y, 0.0)

    # MaxPool1d over the full conv-output length == max over the sublane axis.
    o_ref[...] = jnp.max(y, axis=1).astype(o_ref.dtype)


@functools.partial(jax.jit, static_argnames=("kernel_size", "block_b"))
def cnn_forward(x, weight, bias, *, kernel_size=5, block_b=256):
    """x: (B, C, L) f32; weight: (O, C, K); bias: (O,). Returns squeeze((B, O))."""
    B, C, L = x.shape
    O = weight.shape[0]
    K = kernel_size
    L_out = L - K + 1

    TB = min(B, block_b)              # examples per grid step
    num_blocks = pl.cdiv(B, TB)
    B_pad = num_blocks * TB

    # Layout plumbing (cheap, done once in the wrapper):
    #   x      -> NLC, flattened to (B_pad*L, C) rows ordered (example, position)
    #   weight -> (K*C, O) so `patches @ w` is the whole convolution
    x_nlc = jnp.transpose(x, (0, 2, 1)).reshape(B * L, C)
    if B_pad != B:
        x_nlc = jnp.pad(x_nlc, ((0, (B_pad - B) * L), (0, 0)))
    w2 = jnp.transpose(weight, (2, 1, 0)).reshape(K * C, O)
    b2 = bias.reshape(1, O)

    kernel = functools.partial(_cnn_kernel, L=L, L_out=L_out)
    out = pl.pallas_call(
        kernel,
        out_shape=jax.ShapeDtypeStruct((B_pad, O), x.dtype),
        grid_spec=pltpu.PrefetchScalarGridSpec(
            num_scalar_prefetch=0,
            grid=(num_blocks,),
            in_specs=[
                pl.BlockSpec((TB * L, C), lambda i: (i, 0)),
                pl.BlockSpec((K * C, O), lambda i: (0, 0)),   # resident weight
                pl.BlockSpec((1, O), lambda i: (0, 0)),       # resident bias
            ],
            out_specs=pl.BlockSpec((TB, O), lambda i: (i, 0)),
        ),
        compiler_params=pltpu.CompilerParams(
            dimension_semantics=("parallel",)),
    )(x_nlc, w2, b2)

    out = out[:B]
    # matches torch .squeeze(): drop all size-1 dims
    return jnp.squeeze(out)


def _reference(x, weight, bias):
    """Pure-JAX reference of the PyTorch forward for validation."""
    B, C, L = x.shape
    O, _, K = weight.shape
    L_out = L - K + 1
    cols = jnp.stack([x[:, :, t:t + K] for t in range(L_out)], axis=1)
    cols = cols.reshape(B, L_out, C * K)
    w = weight.reshape(O, C * K)
    y = jnp.einsum("blf,of->bol", cols, w) + bias[None, :, None]
    y = jnp.maximum(y, 0.0)
    return jnp.squeeze(jnp.max(y, axis=-1))


if __name__ == "__main__":
    # Small, deterministic config consistent with the module's __init__.
    batch = 2
    char_embed_dim = 4      # in_channels
    word_embed_dim = 32     # out_channels
    max_word_length = 16    # sequence length L
    kernel_size = 5

    key = jax.random.PRNGKey(0)
    kx, kw, kb = jax.random.split(key, 3)

    x = jax.random.normal(
        kx, (batch, char_embed_dim, max_word_length), dtype=jnp.float32)

    # PyTorch Conv1d default init: U(-1/sqrt(fan_in), 1/sqrt(fan_in))
    fan_in = char_embed_dim * kernel_size
    bound = 1.0 / (fan_in ** 0.5)
    weight = jax.random.uniform(
        kw, (word_embed_dim, char_embed_dim, kernel_size),
        minval=-bound, maxval=bound, dtype=jnp.float32)
    bias = jax.random.uniform(
        kb, (word_embed_dim,), minval=-bound, maxval=bound, dtype=jnp.float32)

    out = cnn_forward(x, weight, bias, kernel_size=kernel_size)
    out = jax.block_until_ready(out)

    ref = jax.block_until_ready(_reference(x, weight, bias))
    assert out.shape == ref.shape == (batch, word_embed_dim), out.shape
    if not jnp.allclose(out, ref, atol=1e-5, rtol=1e-5):
        raise AssertionError("Pallas kernel output mismatch vs reference")

    print("KERNEL_OK")
</pallas_src>

<mosaic_0001>
module attributes {stable_mosaic.version = 11 : i64} {
  func.func @_cnn_kernel(%arg0: i32, %arg1: memref<32x4xf32, #tpu.memory_space<vmem>>, %arg2: memref<20x32xf32, #tpu.memory_space<vmem>>, %arg3: memref<1x32xf32, #tpu.memory_space<vmem>>, %arg4: memref<2x32xf32, #tpu.memory_space<vmem>>) attributes {dimension_semantics = [#tpu.dimension_semantics<parallel>], iteration_bounds = array<i64: 1>, scalar_prefetch = 0 : i64, scratch_operands = 0 : i64, tpu.core_type = #tpu.core_type<tc>, window_params = [{transform_indices = @transform_0, window_bounds = array<i64: 32, 4>}, {pipeline_mode = #tpu.pipeline_mode<synchronous>, transform_indices = @transform_1, window_bounds = array<i64: 20, 32>}, {pipeline_mode = #tpu.pipeline_mode<synchronous>, transform_indices = @transform_2, window_bounds = array<i64: 1, 32>}, {transform_indices = @transform_3, window_bounds = array<i64: 2, 32>}]} {
    %c0 = arith.constant 0 : index
    %c0_0 = arith.constant 0 : index
    %0 = vector.load %arg1[%c0, %c0_0] : memref<32x4xf32, #tpu.memory_space<vmem>>, vector<32x4xf32>
    %cst = arith.constant 0.000000e+00 : f32
    %1 = vector.broadcast %cst : f32 to vector<4x4xf32>
    %2 = tpu.concatenate %0, %1 in 0 : vector<32x4xf32>, vector<4x4xf32> -> vector<36x4xf32>
    %3 = vector.extract_strided_slice %2 {offsets = [0, 0], sizes = [32, 4], strides = [1, 1]} : vector<36x4xf32> to vector<32x4xf32>
    %4 = vector.extract_strided_slice %2 {offsets = [1, 0], sizes = [32, 4], strides = [1, 1]} : vector<36x4xf32> to vector<32x4xf32>
    %5 = vector.extract_strided_slice %2 {offsets = [2, 0], sizes = [32, 4], strides = [1, 1]} : vector<36x4xf32> to vector<32x4xf32>
    %6 = vector.extract_strided_slice %2 {offsets = [3, 0], sizes = [32, 4], strides = [1, 1]} : vector<36x4xf32> to vector<32x4xf32>
    %7 = vector.extract_strided_slice %2 {offsets = [4, 0], sizes = [32, 4], strides = [1, 1]} : vector<36x4xf32> to vector<32x4xf32>
    %8 = tpu.concatenate %3, %4, %5, %6, %7 in 1 : vector<32x4xf32>, vector<32x4xf32>, vector<32x4xf32>, vector<32x4xf32>, vector<32x4xf32> -> vector<32x20xf32>
    %c0_1 = arith.constant 0 : index
    %c0_2 = arith.constant 0 : index
    %9 = vector.load %arg2[%c0_1, %c0_2] : memref<20x32xf32, #tpu.memory_space<vmem>>, vector<20x32xf32>
    %cst_3 = arith.constant dense<0.000000e+00> : vector<32x32xf32>
    %10 = tpu.matmul %8, %9, %cst_3 {dimension_numbers = #tpu.dot_dimension_numbers<[1], [0], [0], [1], [0, 0, 1, 1], [], []>} : vector<32x20xf32>, vector<20x32xf32>, vector<32x32xf32> -> vector<32x32xf32>
    %c0_4 = arith.constant 0 : index
    %c0_5 = arith.constant 0 : index
    %11 = vector.load %arg3[%c0_4, %c0_5] : memref<1x32xf32, #tpu.memory_space<vmem>>, vector<1x32xf32>
    %12 = vector.broadcast %11 : vector<1x32xf32> to vector<32x32xf32>
    %13 = arith.addf %10, %12 : vector<32x32xf32>
    %cst_6 = arith.constant 0.000000e+00 : f32
    %14 = vector.broadcast %cst_6 : f32 to vector<32x32xf32>
    %15 = arith.maximumf %13, %14 : vector<32x32xf32>
    %16 = vector.shape_cast %15 : vector<32x32xf32> to vector<2x16x32xf32>
    %17 = tpu.iota {dimensions = array<i32: 1>} : vector<1x16x1xi32>
    %c12_i32 = arith.constant 12 : i32
    %18 = vector.broadcast %c12_i32 : i32 to vector<1x16x1xi32>
    %19 = arith.cmpi slt, %17, %18 : vector<1x16x1xi32>
    %cst_7 = arith.constant 0.000000e+00 : f32
    %20 = vector.shape_cast %19 : vector<1x16x1xi1> to vector<1x16x1xi1>
    %21 = vector.broadcast %20 : vector<1x16x1xi1> to vector<2x16x32xi1>
    %22 = vector.broadcast %cst_7 : f32 to vector<2x16x32xf32>
    %23 = arith.select %21, %16, %22 : vector<2x16x32xi1>, vector<2x16x32xf32>
    %cst_8 = arith.constant dense<0xFF800000> : vector<2x32xf32>
    %24 = vector.multi_reduction <maximumf>, %23, %cst_8 [1] : vector<2x16x32xf32> to vector<2x32xf32>
    %c0_9 = arith.constant 0 : index
    %c0_10 = arith.constant 0 : index
    %25 = vector.load %arg4[%c0_9, %c0_10] : memref<2x32xf32, #tpu.memory_space<vmem>>, vector<2x32xf32>
    tpu.vector_store %arg4[%c0_9, %c0_10], %24 {strides = array<i32>} : memref<2x32xf32, #tpu.memory_space<vmem>>, vector<2x32xf32>,
    return
  }
  func.func @transform_0(%arg0: i32) -> (i32, i32) {
    %c0_i32 = arith.constant 0 : i32
    %c0_i32_0 = arith.constant 0 : i32
    return %arg0, %c0_i32 : i32, i32
  }
  func.func @transform_1(%arg0: i32) -> (i32, i32) {
    %c0_i32 = arith.constant 0 : i32
    %c0_i32_0 = arith.constant 0 : i32
    %c0_i32_1 = arith.constant 0 : i32
    return %c0_i32, %c0_i32_0 : i32, i32
  }
  func.func @transform_2(%arg0: i32) -> (i32, i32) {
    %c0_i32 = arith.constant 0 : i32
    %c0_i32_0 = arith.constant 0 : i32
    %c0_i32_1 = arith.constant 0 : i32
    return %c0_i32, %c0_i32_0 : i32, i32
  }
  func.func @transform_3(%arg0: i32) -> (i32, i32) {
    %c0_i32 = arith.constant 0 : i32
    %c0_i32_0 = arith.constant 0 : i32
    return %arg0, %c0_i32 : i32, i32
  }
}

</mosaic_0001>

<bundles_post_ra>
// kernel: cnn_forward.1
= control target key start
LH: loop header
LB: loop body
LE: loop exit
PB: predicated region body
PF: predicated region fallthrough
CT: control target
= control target key end

     0   :  { %vm24_vm0 = vcmask 1046528   ;;  %v363_v7 = vmov 0.0   ;;  %s493_s0 = inlined_call_operand.vmem [shape: f32[32,4], index: 0, kind: input, shape index: {}]   ;;  %s494_s1 = inlined_call_operand.vmem [shape: f32[20,32], index: 1, kind: input, shape index: {}]   ;;  %s495_s2 = inlined_call_operand.vmem [shape: f32[1,32], index: 2, kind: input, shape index: {}]   ;;  %s496_s3 = inlined_call_operand.hbm [shape: f32[2,32], index: 3, kind: output, shape index: {}]  }
   0x1   :  { %v392_v0 = vld [vmem:[%s493_s0 + $0x8] sm:$0xff]  ;;  %v397_v1 = vld [vmem:[%s493_s0 + $0x10] sm:$0xff]  ;;  %v402_v2 = vld [vmem:[%s493_s0] sm:$0xff]  ;;  %v32_v8 = vrot.slane %v363_v7, 1 }
   0x2   :  { %v26_v3 = vrot.slane %v392_v0, 1  ;;  %v28_v4 = vrot.slane %v397_v1, 1  ;;  %v25_v5 = vrot.slane %v402_v2, 1  ;;  %v410_v6 = vld [vmem:[%s493_s0 + $0x18] sm:$0xff] }
   0x3   :  { %v30_v9 = vrot.slane %v410_v6, 1 }
   0x4   :  { %v29_v10 = vsel %vm24_vm0, %v26_v3, %v28_v4  ;;  %v27_v11 = vsel %vm24_vm0, %v25_v5, %v26_v3 }
   0x5   :  { %8 = vsyncpa [#allocation3], 0  ;;  %s364_s20 = smov 4   ;;  %v50_v12 = vrot.slane %v397_v1, 2  ;;  %v52_v13 = vrot.slane %v410_v6, 2  ;;  %v33_v14 = vsel %vm24_vm0, %v30_v9, %v32_v8  ;;  %v31_v15 = vsel %vm24_vm0, %v28_v4, %v30_v9  ;;  %v132_v21 = vld [vmem:[%s494_s1] sm:$0xff] }
   0x6   :  { %36 = vrot.lane.b32.xlu1 %v29_v10, %s364_s20  ;;  %34 = vrot.lane.b32.xlu0 %v27_v11, %s364_s20  ;;  %v47_v16 = vrot.slane %v402_v2, 2  ;;  %v48_v17 = vrot.slane %v392_v0, 2  ;;  %vm46_vm1 = vcmask 1045504   ;;  %v54_v20 = vrot.slane %v363_v7, 2  ;;  %v133_v22 = vld [vmem:[%s494_s1 + $0x8] sm:$0xff]  ;;  %s365_s24 = smov 8  }
   0x7   :  { %v53_v18 = vsel %vm46_vm1, %v50_v12, %v52_v13  ;;  %v72_v24 = vrot.slane %v397_v1, 3  ;;  %v325_v25 = vpack.c.bf16 %v133_v22, %v132_v21  ;;  %v74_v27 = vrot.slane %v410_v6, 3  ;;  %v134_v30 = vld [vmem:[%s494_s1 + $0x10] sm:$0xf]  ;;  %s366_s27 = smov 12   ;;  %s367_s1 = smov 16  }
   0x8   :  { %v49_v19 = vsel %vm46_vm1, %v47_v16, %v48_v17  ;;  %v51_v23 = vsel %vm46_vm1, %v48_v17, %v50_v12  ;;  %v55_v26 = vsel %vm46_vm1, %v52_v13, %v54_v20  ;;  %v69_v28 = vrot.slane %v402_v2, 3 }
   0x9   :  { %v70_v29 = vrot.slane %v392_v0, 3  ;;  %vm68_vm2 = vcmask 1044480   ;;  %326 = vmatprep.subr.bf16.mxu0 %v325_v25  ;;  %329 = vmatprep.subr.bf16.mxu1 %v325_v25  ;;  %vm90_vm3 = vcmask 1043456   ;;  %v76_v33 = vrot.slane %v363_v7, 3 }
   0xa   :  { %40 = vrot.lane.b32.xlu1 %v33_v14, %s364_s20  ;;  %38 = vrot.lane.b32.xlu0 %v31_v15, %s364_s20  ;;  %v75_v31 = vsel %vm68_vm2, %v72_v24, %v74_v27  ;;  %v94_v34 = vrot.slane %v397_v1, 4  ;;  %v96_v35 = vrot.slane %v410_v6, 4  ;;  %v91_v38 = vrot.slane %v402_v2, 4  ;;  %v300_v15 = vld [vmem:[%s495_s2] ss:$0 sm:$0xff]  ;;  %s368_s2 = smov [#allocation2]  }
   0xb   :  { %328 = vmatpush3.bf16.msra.mxu0 %v325_v25  ;;  %331 = vmatpush3.bf16.msra.mxu1 %v325_v25  ;;  %v71_v32 = vsel %vm68_vm2, %v69_v28, %v70_v29  ;;  %v77_v36 = vsel %vm68_vm2, %v74_v27, %v76_v33  ;;  %v73_v37 = vsel %vm68_vm2, %v70_v29, %v72_v24  ;;  %v92_v39 = vrot.slane %v392_v0, 4  ;;  %s292_s30 = sshll.u32 %s368_s2, 4  ;;  %s293_s30 = int_to_ptr.vmem [resolvable:$true] %s292_s30 }
   0xc   :  { %317 = vmatprep.subr.msk.mxu0 %vm90_vm3, %v134_v30  ;;  %330 = vmatprep.subr.msk.mxu1 %vm90_vm3, %v134_v30  ;;  %v97_v40 = vsel %vm90_vm3, %v94_v34, %v96_v35  ;;  %v98_v42 = vrot.slane %v363_v7, 4  ;;  %vm112_vm4 = vcmask 31744   ;;  %vm117_vm5 = vcmask 64512   ;;  %s339_s4 = scalar_lea.vmem %s293_s30, 32  ;;  %p344_p1 = scmp.lt.s32.totalorder %s293_s30, %s293_s30 }
   0xd   :  { %v93_v41 = vsel %vm90_vm3, %v91_v38, %v92_v39  ;;  %v95_v44 = vsel %vm90_vm3, %v92_v39, %v94_v34  ;;  %vm122_vm6 = vcmask 97280   ;;  %vm127_vm7 = vcmask 130048   ;;  %p340_p0 = scmp.ne.s32.totalorder %s293_s30, %s339_s4  ;;  %p345_p2 = scmp.lt.s32.totalorder %s339_s4, %s339_s4 }
   0xe   :  { %60 = vrot.lane.b32.xlu1 %v53_v18, %s365_s24  ;;  %56 = vrot.lane.b32.xlu0 %v49_v19, %s365_s24  ;;  %v99_v43 = vsel %vm90_vm3, %v96_v35, %v98_v42  ;;  %vm142_vm8 = vcmask 162816   ;;  %vm260_vm10 = vcmask 261120   ;;  %vm281_vm11 = vcmask 1041409  }
   0xf   :  { %318 = vmatpush3.msk.msra.mxu0 %vm90_vm3, %v134_v30  ;;  %332 = vmatpush3.msk.msra.mxu1 %vm90_vm3, %v134_v30  ;;  %vm284_vm12 = vcmask 254976   ;;  %p346_p3 = por %p345_p2, %p344_p1 }
  0x11   :  { %p347_p4 = pnand %p346_p3, %p340_p0 }
  0x12   :  { %62 = vrot.lane.b32.xlu1 %v55_v26, %s365_s24  ;;  %58 = vrot.lane.b32.xlu0 %v51_v23, %s365_s24 }
  0x16   :  { %82 = vrot.lane.b32.xlu1 %v75_v31, %s366_s27  ;;  %78 = vrot.lane.b32.xlu0 %v71_v32, %s366_s27 }
  0x1a   :  { %84 = vrot.lane.b32.xlu1 %v77_v36, %s366_s27  ;;  %80 = vrot.lane.b32.xlu0 %v73_v37, %s366_s27 }
  0x1e   :  { %104 = vrot.lane.b32.xlu1 %v97_v40, %s367_s1  ;;  %100 = vrot.lane.b32.xlu0 %v93_v41, %s367_s1 }
  0x22   :  { %106 = vrot.lane.b32.xlu1 %v99_v43, %s367_s1  ;;  %102 = vrot.lane.b32.xlu0 %v95_v44, %s367_s1 }
  0x78   :  { %v37_v45 = vpop.permute.xlu1 %36  ;;  %v35_v46 = vpop.permute.xlu0 %34 }
  0x79   :  { %v113_v57 = vsel %vm112_vm4, %v402_v2, %v35_v46  ;;  %v114_v2 = vsel %vm112_vm4, %v392_v0, %v37_v45 }
  0x7c   :  { %v41_v47 = vpop.permute.xlu1 %40  ;;  %v39_v48 = vpop.permute.xlu0 %38 }
  0x7d   :  { %v115_v58 = vsel %vm112_vm4, %v397_v1, %v39_v48  ;;  %v116_v1 = vsel %vm112_vm4, %v410_v6, %v41_v47  ;;  %v247_v6 = vlaneseq }
  0x7f   :  { %v248_v14 = vshrl.u32 %v247_v6, 7 }
  0x80   :  { %v61_v49 = vpop.permute.xlu1 %60  ;;  %v57_v50 = vpop.permute.xlu0 %56 }
  0x81   :  { %v120_v59 = vsel %vm117_vm5, %v115_v58, %v61_v49  ;;  %v118_v60 = vsel %vm117_vm5, %v113_v57, %v57_v50  ;;  %v249_v16 = vadd.s32 8, %v248_v14 }
  0x83   :  { %vm251_vm9 = vcmp.lt.s32.totalorder %v249_v16, 12 }
  0x84   :  { %v63_v51 = vpop.permute.xlu1 %62  ;;  %v59_v52 = vpop.permute.xlu0 %58 }
  0x85   :  { %v121_v7 = vsel %vm117_vm5, %v116_v1, %v63_v51  ;;  %v119_v8 = vsel %vm117_vm5, %v114_v2, %v59_v52 }
  0x88   :  { %v83_v53 = vpop.permute.xlu1 %82  ;;  %v79_v54 = vpop.permute.xlu0 %78 }
  0x89   :  { %v125_v61 = vsel %vm122_vm6, %v120_v59, %v83_v53  ;;  %v123_v62 = vsel %vm122_vm6, %v118_v60, %v79_v54 }
  0x8c   :  { %v85_v55 = vpop.permute.xlu1 %84  ;;  %v81_v56 = vpop.permute.xlu0 %80 }
  0x8d   :  { %v126_v9 = vsel %vm122_vm6, %v121_v7, %v85_v55  ;;  %v124_v10 = vsel %vm122_vm6, %v119_v8, %v81_v56 }
  0x90   :  { %v105_v63 = vpop.permute.xlu1 %104  ;;  %v101_v3 = vpop.permute.xlu0 %100 }
  0x91   :  { %v128_v4 = vsel %vm127_vm7, %v123_v62, %v101_v3  ;;  %v130_v5 = vsel %vm127_vm7, %v125_v61, %v105_v63 }
  0x92   :  { %319 = vmatprep.mubr.msk.f32.mxu0 %vm142_vm8, %v128_v4  ;;  %322 = vmatprep.mubr.msk.f32.mxu1 %vm142_vm8, %v130_v5 }
  0x94   :  { %v107_v11 = vpop.permute.xlu1 %106  ;;  %v103_v12 = vpop.permute.xlu0 %102 }
  0x95   :  { %v131_v13 = vsel %vm127_vm7, %v126_v9, %v107_v11  ;;  %v129_v0 = vsel %vm127_vm7, %v124_v10, %v103_v12 }
  0x96   :  { %320 = vmatmul.mubr.msk.f32.vlgmr.msra.gmra.mrb[0].mxu0 %vm142_vm8, %v129_v0  ;;  %323 = vmatmul.mubr.msk.f32.vlgmr.msra.gmra.mrb[0].mxu1 %vm142_vm8, %v131_v13 }
 0x169   :  { %v321_v17 = vpop.f32.mrb[0].mxu0  ;;  %v324_v18 = vpop.f32.mrb[0].mxu1 }
 0x16a   :  { %v230_v19 = vadd.f32 %v321_v17, %v300_v15  ;;  %v240_v20 = vadd.f32 %v324_v18, %v300_v15  ;;  %v224_v21 = vpop.f32.mrb[1].mxu0  ;;  %v234_v22 = vpop.f32.mrb[1].mxu1 }
 0x16b   :  { %v225_v23 = vadd.f32 %v300_v15, %v224_v21  ;;  %v235_v24 = vadd.f32 %v300_v15, %v234_v22 }
 0x16c   :  { %v244_v25 = vmax.f32 %v230_v19, 0.0  ;;  %v246_v26 = vmax.f32 %v240_v20, 0.0 }
 0x16d   :  { %v243_v27 = vmax.f32 %v225_v23, 0.0  ;;  %v245_v28 = vmax.f32 %v235_v24, 0.0 }
 0x16e   :  { %v257_v29 = vsel %vm251_vm9, %v244_v25, 0.0  ;;  %v259_v30 = vsel %vm251_vm9, %v246_v26, 0.0 }
 0x16f   :  { %v262_v31 = vsel %vm260_vm10, %v257_v29, -inf  ;;  %v271_v32 = vsel %vm260_vm10, %v259_v30, -inf  ;;  %v261_v33 = vsel %vm260_vm10, %v243_v27, -inf  ;;  %v270_v34 = vsel %vm260_vm10, %v245_v28, -inf }
 0x170   :  { %v263_v35 = vmax.f32 %v261_v33, %v262_v31  ;;  %v272_v36 = vmax.f32 %v270_v34, %v271_v32 }
 0x172   :  { %v264_v37 = vrot.slane %v263_v35, 4  ;;  %v273_v38 = vrot.slane %v272_v36, 4 }
 0x174   :  { %v265_v39 = vmax.f32 %v263_v35, %v264_v37  ;;  %v274_v40 = vmax.f32 %v272_v36, %v273_v38 }
 0x176   :  { %v266_v41 = vrot.slane %v265_v39, 2  ;;  %v275_v42 = vrot.slane %v274_v40, 2 }
 0x178   :  { %v267_v43 = vmax.f32 %v265_v39, %v266_v41  ;;  %v276_v44 = vmax.f32 %v274_v40, %v275_v42 }
 0x17a   :  { %v268_v45 = vrot.slane %v267_v43, 1  ;;  %v277_v46 = vrot.slane %v276_v44, 1 }
 0x17c   :  { %v269_v47 = vmax.f32 %v267_v43, %v268_v45  ;;  %v278_v48 = vmax.f32 %v276_v44, %v277_v46 }
 0x17e   :  { %v282_v49 = vsel %vm281_vm11, %v278_v48, %v269_v47 }
 0x17f   :  { %285 = vst.msk [vmem:[#allocation2] sm:$0x3] %vm284_vm12, %v282_v49 }
 0x180   :  { %350 = shalt.err (!%p347_p4)
}
 0x181   :  { %s351_s7 = scalar_lea.hbm %s496_s3, 32 }
 0x182   :  { %p352_p5 = scmp.ne.s32.totalorder %s496_s3, %s351_s7  ;;  %p355_p6 = scmp.lt.u32.totalorder %s351_s7, %s496_s3 }
 0x184   :  { %p357_p7 = pnand %p355_p6, %p352_p5 }
 0x186   :  { %360 = shalt.err (!%p357_p7)
}
 0x187   :  { %295 = dma.vmem_to_hbm [thread:$0]  %s293_s30, 32, %s496_s3, [#allocation3]  }
 0x188   :  { %361 = dma.done.wait [#allocation3], 32  }
 0x189   :  { %362 = vsyncadd [#allocation3], 4294967264 }
 0x18a   :  { %299 = vsyncpa [#allocation3], 1 }

</bundles_post_ra>
